<compile_context>
chip_gen: v7x
topology: tpu7x:2x2x1
jax: 0.10.0
libtpu: 0.0.40
codegen_flags: <defaults>
</compile_context>

<pallas_src>
import functools

import jax
import jax.numpy as jnp
from jax import lax
from jax.experimental import pallas as pl
from jax.experimental.pallas import tpu as pltpu


_MAX_TILE_ROWS = 2048                 # row cap when D is large (tile already >= several MiB)
_MIN_TILE_X_BYTES = 8 * 1024 * 1024   # byte target per x tile when D is small (v7x step overhead)


def _vmem_budgets():
    """Generation-aware (tile_budget_bytes, vmem_limit_bytes)."""
    vmem_bytes = 64 * 1024 * 1024                      # conservative default == v7x per-TC VMEM
    try:
        info = pltpu.get_tpu_info()
        vmem_bytes = int(getattr(info, "vmem_capacity_bytes", vmem_bytes))
    except Exception:
        pass
    if vmem_bytes >= 96 * 1024 * 1024:                 # v5e / v6e: 128 MiB physical VMEM
        return 100 * 1024 * 1024, 112 * 1024 * 1024
    return 40 * 1024 * 1024, 48 * 1024 * 1024          # v7x: 64 MiB physical VMEM


# ----------------------------------------------------------------------------- kernels
def _logreg_kernel_lane_dense(x_ref, w_ref, b_ref, o_ref):
    # x_ref: [TM, D] (pipelined), w_ref: [O, D] (resident), b_ref: [O, 1] (resident),
    # o_ref: [O, TM] -- batch in the lane dim => unmasked, lane-dense stores.
    z = lax.dot_general(
        w_ref[...], x_ref[...],
        dimension_numbers=(((1,), (1,)), ((), ())),        # contract over D
        preferred_element_type=jnp.float32,
    )                                                      # [O, TM]
    z = z + b_ref[...].astype(jnp.float32)                 # broadcast (O, 1) over lanes
    o_ref[...] = jax.nn.sigmoid(z).astype(o_ref.dtype)


def _logreg_kernel_rowmajor(x_ref, w_ref, b_ref, o_ref):
    # x_ref: [TM, D], w_ref: [O, D] (resident), b_ref: [1, O], o_ref: [TM, O]
    z = lax.dot_general(
        x_ref[...], w_ref[...],
        dimension_numbers=(((1,), (1,)), ((), ())),        # x @ W^T without transposing W
        preferred_element_type=jnp.float32,
    )                                                      # [TM, O]
    z = z + b_ref[...].astype(jnp.float32)
    o_ref[...] = jax.nn.sigmoid(z).astype(o_ref.dtype)


def _logreg_kernel_ktiled(x_ref, w_ref, b_ref, o_ref, acc_ref, *, d_total, tk, need_mask):
    # Grid = (batch tiles, K tiles).  x_ref: [TM, TK], w_ref: [O, TK], b_ref: [1, O],
    # o_ref: [TM, O], acc_ref: f32 [TM, O] VMEM scratch (persists across the K axis).
    k = pl.program_id(1)

    @pl.when(k == 0)
    def _():
        acc_ref[...] = jnp.zeros_like(acc_ref)

    x = x_ref[...]
    w = w_ref[...]
    if need_mask:  # static: only traced when D % TK != 0 (zero out padded feature columns)
        col_x = k * tk + lax.broadcasted_iota(jnp.int32, x.shape, dimension=1)
        x = jnp.where(col_x < d_total, x, jnp.zeros_like(x))
        col_w = k * tk + lax.broadcasted_iota(jnp.int32, w.shape, dimension=1)
        w = jnp.where(col_w < d_total, w, jnp.zeros_like(w))

    acc_ref[...] += lax.dot_general(
        x, w,
        dimension_numbers=(((1,), (1,)), ((), ())),
        preferred_element_type=jnp.float32,
    )

    @pl.when(k == pl.num_programs(1) - 1)
    def _():
        z = acc_ref[...] + b_ref[...].astype(jnp.float32)
        o_ref[...] = jax.nn.sigmoid(z).astype(o_ref.dtype)


# ----------------------------------------------------------------------------- tile sizing
def _round_down(v, g):
    return (v // g) * g


def _pick_batch_tile(B, D, O, itemsize, granule, tile_budget):
    """Batch tile for the single-pass (full-D) path. Returns 0 if it can't fit VMEM."""
    # Weights (and bias) are double-buffered by Pallas even with a constant index_map.
    resident = 2 * D * O * itemsize + 2 * max(O, 128) * itemsize
    per_row = 2 * (D + O) * itemsize              # double-buffered x tile + out tile, per row
    avail = tile_budget - resident
    if avail < per_row:
        return 0
    tm = avail // per_row
    # Byte-targeted cap: small D -> raise the row cap so a tile still moves >= ~8 MiB of x.
    rows_for_bytes = -(-_MIN_TILE_X_BYTES // max(D * itemsize, 1))
    tm = min(tm, max(_MAX_TILE_ROWS, rows_for_bytes))
    if tm >= B:
        if B >= 2 * granule:
            # Split so the grid has >= 2 steps -> both v7x TensorCores participate.
            tm = _round_down(pl.cdiv(B, 2), granule)
        else:
            tm = B                                # full-dim block: legal at any size
    else:
        tm = _round_down(tm, granule)             # never round UP past the budget
    return int(max(tm, 0))


def _pick_k_tiles(B, D, O, itemsize, tile_budget):
    """(batch tile, feature tile) for the D-tiled reduction path."""
    tm = min(512, B)
    if tm >= B:
        if B >= 16:
            tm = _round_down(pl.cdiv(B, 2), 8)    # >= 2 batch steps for megacore
        else:
            tm = B
    else:
        tm = _round_down(tm, 8)
    tm = max(tm, min(B, 8))
    fixed = 2 * tm * O * itemsize + tm * O * 4 + 2 * max(O, 128) * itemsize  # out dbuf + acc + bias
    per_tk = 2 * (tm + O) * itemsize                                          # x + w tiles, dbuf'd
    avail = tile_budget - fixed
    tk = max(avail // per_tk, 128)
    tk = max(_round_down(tk, 128), 128)
    if tk >= D:
        tk = D                                    # degenerate single K step (still correct)
    return int(tm), int(tk)


# ----------------------------------------------------------------------------- forward
def logistic_regression_forward(x, weight, bias, *, tile_budget_bytes=None):
    """x: [B, ...]; weight: [O, D]; bias: [O]  ->  sigmoid(flatten(x,1) @ W^T + b), shape [B, O]."""
    B = x.shape[0]
    x_flat = x.reshape(B, -1)                     # flatten(start_dim=1)
    D = x_flat.shape[1]
    O, Dw = weight.shape
    assert Dw == D, f"weight feature dim {Dw} != flattened input dim {D}"
    dtype = x_flat.dtype
    itemsize = jnp.dtype(dtype).itemsize

    auto_budget, vmem_limit = _vmem_budgets()
    tile_budget = auto_budget if tile_budget_bytes is None else int(tile_budget_bytes)
    vmem_limit = max(vmem_limit, min(tile_budget, auto_budget) + 8 * 1024 * 1024)

    cost = pl.CostEstimate(
        flops=2 * B * D * O,
        transcendentals=B * O,
        bytes_accessed=(B * D + D * O + B * O + O) * itemsize,
    )

    # ---- path selection -----------------------------------------------------
    lane_dense = O < 128                          # small O -> batch in lanes, unmasked stores
    tm = 0
    if lane_dense:
        tm = _pick_batch_tile(B, D, O, itemsize, granule=128, tile_budget=tile_budget)
        if tm == 0:
            lane_dense = False
    if not lane_dense:
        tm = _pick_batch_tile(B, D, O, itemsize, granule=8, tile_budget=tile_budget)

    if tm > 0:
        # Single-pass path: full feature dim per tile, weights resident across the grid.
        grid = (pl.cdiv(B, tm),)
        cparams = pltpu.CompilerParams(
            dimension_semantics=("parallel",),    # independent batch rows -> megacore on v7x
            vmem_limit_bytes=vmem_limit,
        )
        if lane_dense:
            out_t = pl.pallas_call(
                _logreg_kernel_lane_dense,
                out_shape=jax.ShapeDtypeStruct((O, B), dtype),
                grid_spec=pl.GridSpec(
                    grid=grid,
                    in_specs=[
                        pl.BlockSpec((tm, D), lambda i: (i, 0)),   # x tile (pipelined)
                        pl.BlockSpec((O, D), lambda i: (0, 0)),    # weights (resident)
                        pl.BlockSpec((O, 1), lambda i: (0, 0)),    # bias (resident)
                    ],
                    out_specs=pl.BlockSpec((O, tm), lambda i: (0, i)),
                ),
                compiler_params=cparams,
                cost_estimate=cost,
            )(x_flat, weight, bias.reshape(O, 1))
            if O == 1:
                return out_t.reshape(B, O)        # [1, B] -> [B, 1]: pure reshape
            return jnp.transpose(out_t)           # tiny: only B*O elements
        else:
            return pl.pallas_call(
                _logreg_kernel_rowmajor,
                out_shape=jax.ShapeDtypeStruct((B, O), dtype),
                grid_spec=pl.GridSpec(
                    grid=grid,
                    in_specs=[
                        pl.BlockSpec((tm, D), lambda i: (i, 0)),
                        pl.BlockSpec((O, D), lambda i: (0, 0)),
                        pl.BlockSpec((1, O), lambda i: (0, 0)),
                    ],
                    out_specs=pl.BlockSpec((tm, O), lambda i: (i, 0)),
                ),
                compiler_params=cparams,
                cost_estimate=cost,
            )(x_flat, weight, bias.reshape(1, O))

    # ---- D-tiled fallback: feature dim too large for one VMEM tile ----------
    tm, tk = _pick_k_tiles(B, D, O, itemsize, tile_budget)
    kernel = functools.partial(
        _logreg_kernel_ktiled, d_total=D, tk=tk, need_mask=(D % tk != 0)
    )
    cparams = pltpu.CompilerParams(
        dimension_semantics=("parallel", "arbitrary"),   # batch parallel, D is a reduction
        vmem_limit_bytes=vmem_limit,
    )
    return pl.pallas_call(
        kernel,
        out_shape=jax.ShapeDtypeStruct((B, O), dtype),
        grid_spec=pltpu.PrefetchScalarGridSpec(
            num_scalar_prefetch=0,
            grid=(pl.cdiv(B, tm), pl.cdiv(D, tk)),
            in_specs=[
                pl.BlockSpec((tm, tk), lambda i, k: (i, k)),   # x tile (pipelined over B, D)
                pl.BlockSpec((O, tk), lambda i, k: (0, k)),    # weight K-slab (pipelined over D)
                pl.BlockSpec((1, O), lambda i, k: (0, 0)),     # bias (resident)
            ],
            out_specs=pl.BlockSpec((tm, O), lambda i, k: (i, 0)),
            scratch_shapes=[pltpu.VMEM((tm, O), jnp.float32)],
        ),
        compiler_params=cparams,
        cost_estimate=cost,
    )(x_flat, weight, bias.reshape(1, O))


if __name__ == "__main__":
    # Small shapes consistent with the module: x is [B, C, H, W], input_dim = C*H*W, output_dim = 1.
    B, C, H, W = 2, 4, 16, 16
    input_dim = C * H * W
    output_dim = 1

    key = jax.random.PRNGKey(0)
    kx, kw, kb, kx2, kw2, kb2, kw3, kb3 = jax.random.split(key, 8)
    x = jax.random.normal(kx, (B, C, H, W), dtype=jnp.float32)

    # 1) Module's actual init: nn.init.constant_(weight/bias, 0.0) -> sigmoid(0) = 0.5 everywhere.
    weight0 = jnp.zeros((output_dim, input_dim), dtype=jnp.float32)
    bias0 = jnp.zeros((output_dim,), dtype=jnp.float32)
    out0 = jax.block_until_ready(logistic_regression_forward(x, weight0, bias0))
    assert out0.shape == (B, output_dim)
    assert jnp.allclose(out0, 0.5, atol=1e-6)

    # 2) Numerical check of the single-pass lane-dense path (O == 1) vs plain-JAX reference.
    weight = 0.05 * jax.random.normal(kw, (output_dim, input_dim), dtype=jnp.float32)
    bias = 0.1 * jax.random.normal(kb, (output_dim,), dtype=jnp.float32)
    out = jax.block_until_ready(logistic_regression_forward(x, weight, bias))
    ref = jax.nn.sigmoid(x.reshape(B, -1) @ weight.T + bias)
    assert out.shape == (B, output_dim)
    assert jnp.allclose(out, ref, atol=1e-5, rtol=1e-5)

    # 3) Lane-dense path with 1 < O < 128 (wrapper-side transpose of the tiny [O, B] result).
    O3 = 4
    weight3 = 0.05 * jax.random.normal(kw3, (O3, input_dim), dtype=jnp.float32)
    bias3 = 0.1 * jax.random.normal(kb3, (O3,), dtype=jnp.float32)
    out3 = jax.block_until_ready(logistic_regression_forward(x, weight3, bias3))
    ref3 = jax.nn.sigmoid(x.reshape(B, -1) @ weight3.T + bias3)
    assert out3.shape == (B, O3)
    assert jnp.allclose(out3, ref3, atol=1e-5, rtol=1e-5)

    # 4) D-tiled reduction fallback (forced via a tiny VMEM budget) with a partial last K tile,
    #    exercising the accumulator + masking path that handles huge feature dims on v7x.
    C2, H2, W2 = 3, 10, 10                         # D = 300, not a multiple of 128
    D2 = C2 * H2 * W2
    x2 = jax.random.normal(kx2, (B, C2, H2, W2), dtype=jnp.float32)
    weight2 = 0.05 * jax.random.normal(kw2, (output_dim, D2), dtype=jnp.float32)
    bias2 = 0.1 * jax.random.normal(kb2, (output_dim,), dtype=jnp.float32)
    out2 = jax.block_until_ready(
        logistic_regression_forward(x2, weight2, bias2, tile_budget_bytes=8 * 1024)
    )
    ref2 = jax.nn.sigmoid(x2.reshape(B, -1) @ weight2.T + bias2)
    assert out2.shape == (B, output_dim)
    assert jnp.allclose(out2, ref2, atol=1e-5, rtol=1e-5)

    print("KERNEL_OK")
</pallas_src>

<mosaic_0001>
module attributes {stable_mosaic.version = 11 : i64} {
  func.func @_logreg_kernel_lane_dense(%arg0: i32, %arg1: memref<2x1024xf32, #tpu.memory_space<vmem>>, %arg2: memref<1x1024xf32, #tpu.memory_space<vmem>>, %arg3: memref<1x1xf32, #tpu.memory_space<vmem>>, %arg4: memref<1x2xf32, #tpu.memory_space<vmem>>) attributes {dimension_semantics = [#tpu.dimension_semantics<parallel>], iteration_bounds = array<i64: 1>, scalar_prefetch = 0 : i64, scratch_operands = 0 : i64, tpu.core_type = #tpu.core_type<tc>, window_params = [{transform_indices = @transform_0, window_bounds = array<i64: 2, 1024>}, {pipeline_mode = #tpu.pipeline_mode<synchronous>, transform_indices = @transform_1, window_bounds = array<i64: 1, 1024>}, {pipeline_mode = #tpu.pipeline_mode<synchronous>, transform_indices = @transform_2, window_bounds = array<i64: 1, 1>}, {transform_indices = @transform_3, window_bounds = array<i64: 1, 2>}]} {
    %c0 = arith.constant 0 : index
    %c0_0 = arith.constant 0 : index
    %0 = vector.load %arg2[%c0, %c0_0] : memref<1x1024xf32, #tpu.memory_space<vmem>>, vector<1x1024xf32>
    %c0_1 = arith.constant 0 : index
    %c0_2 = arith.constant 0 : index
    %1 = vector.load %arg1[%c0_1, %c0_2] : memref<2x1024xf32, #tpu.memory_space<vmem>>, vector<2x1024xf32>
    %cst = arith.constant dense<0.000000e+00> : vector<1x2xf32>
    %2 = tpu.matmul %0, %1, %cst {dimension_numbers = #tpu.dot_dimension_numbers<[1], [1], [0], [0], [0, 0, 1, 0], [], []>} : vector<1x1024xf32>, vector<2x1024xf32>, vector<1x2xf32> -> vector<1x2xf32>
    %c0_3 = arith.constant 0 : index
    %c0_4 = arith.constant 0 : index
    %3 = vector.load %arg3[%c0_3, %c0_4] : memref<1x1xf32, #tpu.memory_space<vmem>>, vector<1x1xf32>
    %4 = vector.broadcast %3 : vector<1x1xf32> to vector<1x2xf32>
    %5 = arith.addf %2, %4 : vector<1x2xf32>
    %6 = arith.negf %5 : vector<1x2xf32>
    %7 = math.exp %6 : vector<1x2xf32>
    %cst_5 = arith.constant 1.000000e+00 : f32
    %8 = vector.broadcast %cst_5 : f32 to vector<1x2xf32>
    %9 = arith.addf %8, %7 : vector<1x2xf32>
    %10 = arith.divf %8, %9 : vector<1x2xf32>
    %c0_6 = arith.constant 0 : index
    %c0_7 = arith.constant 0 : index
    %11 = vector.load %arg4[%c0_6, %c0_7] : memref<1x2xf32, #tpu.memory_space<vmem>>, vector<1x2xf32>
    tpu.vector_store %arg4[%c0_6, %c0_7], %10 {strides = array<i32>} : memref<1x2xf32, #tpu.memory_space<vmem>>, vector<1x2xf32>,
    return
  }
  func.func @transform_0(%arg0: i32) -> (i32, i32) {
    %c0_i32 = arith.constant 0 : i32
    %c0_i32_0 = arith.constant 0 : i32
    return %arg0, %c0_i32 : i32, i32
  }
  func.func @transform_1(%arg0: i32) -> (i32, i32) {
    %c0_i32 = arith.constant 0 : i32
    %c0_i32_0 = arith.constant 0 : i32
    %c0_i32_1 = arith.constant 0 : i32
    return %c0_i32, %c0_i32_0 : i32, i32
  }
  func.func @transform_2(%arg0: i32) -> (i32, i32) {
    %c0_i32 = arith.constant 0 : i32
    %c0_i32_0 = arith.constant 0 : i32
    %c0_i32_1 = arith.constant 0 : i32
    return %c0_i32, %c0_i32_0 : i32, i32
  }
  func.func @transform_3(%arg0: i32) -> (i32, i32) {
    %c0_i32 = arith.constant 0 : i32
    %c0_i32_0 = arith.constant 0 : i32
    return %c0_i32, %arg0 : i32, i32
  }
}

</mosaic_0001>

<bundles_post_ra>
// kernel: tpu_custom_call.1
= control target key start
LH: loop header
LB: loop body
LE: loop exit
PB: predicated region body
PF: predicated region fallthrough
CT: control target
= control target key end

     0   :  { %s598_s0 = inlined_call_operand.hbm [shape: f32[2,1024], index: 0, kind: input, shape index: {}]   ;;  %s599_s1 = inlined_call_operand.hbm [shape: f32[1,1024], index: 1, kind: input, shape index: {}]   ;;  %s600_s2 = inlined_call_operand.<no memory space> [shape: f32[1,1], index: 2, kind: input, shape index: {}]   ;;  %s601_s3 = inlined_call_operand.hbm [shape: f32[1,2], index: 3, kind: output, shape index: {}]  }
   0x1   :  { %v8_v0 = vstv %s600_s2 }
   0x2   :  { %9 = vst [vmem:[#allocation2] sm:$0x1] %v8_v0 }
   0x3   :  { %10 = vsyncpa [#allocation4], 0 }
   0x4   :  { %11 = vsyncpa [#allocation7], 0 }
   0x5   :  { %12 = vsyncpa [#allocation5], 0  ;;  %s534_s14 = smov [#allocation3]   ;;  %s535_s16 = smov [#allocation6]  }
   0x6   :  { %s19_s15 = sshll.u32 %s534_s14, 4  ;;  %s29_s17 = sshll.u32 %s535_s16, 4  ;;  %s20_s15 = int_to_ptr.vmem [resolvable:$true] %s19_s15  ;;  %s30_s17 = int_to_ptr.vmem [resolvable:$true] %s29_s17 }
   0x7   :  { %s462_s20 = scalar_lea.hbm %s598_s0, 256 }
   0x8   :  { %p463_p0 = scmp.ne.s32.totalorder %s598_s0, %s462_s20  ;;  %p466_p1 = scmp.lt.u32.totalorder %s462_s20, %s598_s0 }
   0xa   :  { %p468_p2 = pnand %p466_p1, %p463_p0 }
   0xc   :  { %471 = shalt.err (!%p468_p2)
}
   0xd   :  { %s472_s24 = scalar_lea.vmem %s20_s15, 256  ;;  %p477_p4 = scmp.lt.s32.totalorder %s20_s15, %s20_s15 }
   0xe   :  { %p473_p3 = scmp.ne.s32.totalorder %s20_s15, %s472_s24  ;;  %p478_p5 = scmp.lt.s32.totalorder %s472_s24, %s472_s24 }
  0x10   :  { %p479_p6 = por %p478_p5, %p477_p4 }
  0x12   :  { %p480_p7 = pnand %p479_p6, %p473_p3 }
  0x14   :  { %483 = shalt.err (!%p480_p7)
}
  0x15   :  { %22 = dma.hbm_to_vmem [thread:$0]  %s598_s0, 256, %s20_s15, [#allocation4]  }
  0x16   :  { %s484_s29 = scalar_lea.hbm %s599_s1, 128 }
  0x17   :  { %p485_p8 = scmp.ne.s32.totalorder %s599_s1, %s484_s29  ;;  %p488_p9 = scmp.lt.u32.totalorder %s484_s29, %s599_s1 }
  0x19   :  { %p490_p10 = pnand %p488_p9, %p485_p8 }
  0x1b   :  { %493 = shalt.err (!%p490_p10)
}
  0x1c   :  { %s494_s7 = scalar_lea.vmem %s30_s17, 128  ;;  %p499_p12 = scmp.lt.s32.totalorder %s30_s17, %s30_s17 }
  0x1d   :  { %p495_p11 = scmp.ne.s32.totalorder %s30_s17, %s494_s7  ;;  %p500_p13 = scmp.lt.s32.totalorder %s494_s7, %s494_s7 }
  0x1f   :  { %p501_p0 = por %p500_p13, %p499_p12 }
  0x21   :  { %p502_p1 = pnand %p501_p0, %p495_p11 }
  0x23   :  { %505 = shalt.err (!%p502_p1)
}
  0x24   :  { %32 = dma.hbm_to_vmem [thread:$0]  %s599_s1, 128, %s30_s17, [#allocation7]  }
  0x25   :  { %528 = dma.done.wait [#allocation4], 256  }
  0x26   :  { %529 = vsyncadd [#allocation4], 4294967040 }
  0x27   :  { %530 = dma.done.wait [#allocation7], 128  }
  0x28   :  { %531 = vsyncadd [#allocation7], 4294967168  ;;  %v50_v1 = vlaneseq  ;;  %v536_v2 = vmov 1983009808   ;;  %v537_v4 = vmov 0   ;;  %v42_v10 = vld [vmem:[#allocation3] sm:$0xff] }
  0x29   :  { %v99_v3 = vunpack.c.l.s4 %v536_v2  ;;  %455 = vset.pattern.permute.xlu0 %v537_v4  ;;  %v43_v11 = vld [vmem:[#allocation3 + $0x8] sm:$0xff]  ;;  %v41_v12 = vld [vmem:[#allocation6] sm:$0xff]  ;;  %v97_v15 = vcombine.high %v42_v10, %v42_v10  ;;  %v44_v19 = vld [vmem:[#allocation2] sm:$0x1]  ;;  %s538_s1 = smov [#allocation8]   ;;  %vm425_vm0 = vcmask 8192  }
  0x2a   :  { %v51_v5 = vshrl.u32 %v50_v1, 7  ;;  %v114_v17 = vcombine.high %v43_v11, %v43_v11  ;;  %47 = vperm.xlu0 %455, %v44_v19   ;;  %s433_s9 = sshll.u32 %s538_s1, 4  ;;  %s434_s9 = int_to_ptr.vmem [resolvable:$true] %s433_s9 }
  0x2b   :  { %v100_v6 = vunpack.c.0.s8 %v99_v3  ;;  %s506_s10 = scalar_lea.vmem %s434_s9, 16  ;;  %s510_s11 = scalar_lea.vmem %s434_s9, 32 }
  0x2c   :  { %v61_v8 = vsub.s32 1, %v51_v5  ;;  %v77_v9 = vsub.s32 5, %v51_v5  ;;  %v52_v13 = vsub.s32 0, %v51_v5  ;;  %v73_v14 = vsub.s32 4, %v51_v5  ;;  %p507_p2 = scmp.ne.s32.totalorder %s434_s9, %s506_s10  ;;  %p511_p3 = scmp.lt.s32.totalorder %s434_s9, %s434_s9 }
  0x2d   :  { %v103_v7 = vsub.s32 %v100_v6, %v51_v5  ;;  %v69_v22 = vsub.s32 3, %v51_v5  ;;  %v85_v23 = vsub.s32 7, %v51_v5  ;;  %v65_v34 = vsub.s32 2, %v51_v5  ;;  %p512_p4 = scmp.lt.s32.totalorder %s510_s11, %s506_s10 }
  0x2e   :  { %v62_v20 = vrot.slane %v41_v12, %v61_v8  ;;  %v78_v21 = vrot.slane %v41_v12, %v77_v9  ;;  %v58_v28 = vrot.slane %v41_v12, %v52_v13  ;;  %v74_v30 = vrot.slane %v41_v12, %v73_v14 }
  0x2f   :  { %v104_v16 = vrot.slane %v42_v10, %v103_v7  ;;  %v121_v18 = vrot.slane %v43_v11, %v103_v7  ;;  %v111_v26 = vrot.slane %v97_v15, %v103_v7  ;;  %v128_v27 = vrot.slane %v114_v17, %v103_v7  ;;  %p513_p5 = por %p512_p4, %p511_p3 }
  0x30   :  { %203 = vmatprep.mubr.f32.mxu1 %v62_v20  ;;  %343 = vmatprep.mubr.f32.mxu0 %v78_v21  ;;  %v70_v32 = vrot.slane %v41_v12, %v69_v22  ;;  %v86_v33 = vrot.slane %v41_v12, %v85_v23  ;;  %v81_v35 = vsub.s32 6, %v51_v5  ;;  %v66_v36 = vrot.slane %v41_v12, %v65_v34 }
  0x31   :  { %v112_v24 = vcombine.high %v104_v16, %v104_v16  ;;  %v129_v25 = vcombine.high %v121_v18, %v121_v18  ;;  %v113_v29 = vcombine.high %v111_v26, %v111_v26  ;;  %v130_v31 = vcombine.high %v128_v27, %v128_v27  ;;  %p514_p6 = pnand %p513_p5, %p507_p2 }
  0x32   :  { %v82_v37 = vrot.slane %v41_v12, %v81_v35 }
  0x33   :  { %139 = vmatprep.subr.mxu1 %v112_v24  ;;  %279 = vmatprep.subr.mxu0 %v129_v25 }
  0x34   :  { %140 = vmatpush1.xpose.msra.mxu1 %v104_v16  ;;  %280 = vmatpush1.xpose.msra.mxu0 %v121_v18 }
  0x35   :  { %209 = vmatprep.subr.mxu1 %v113_v29  ;;  %349 = vmatprep.subr.mxu0 %v130_v31 }
  0x37   :  { %204 = vmatmul.mubr.f32.vlgmr.msra.gmra.mrb[0].mxu1 %v58_v28  ;;  %344 = vmatmul.mubr.f32.vlgmr.msra.gmra.mrb[0].mxu0 %v74_v30 }
  0x38   :  { %210 = vmatpush1.xpose.msra.mxu1 %v111_v26  ;;  %350 = vmatpush1.xpose.msra.mxu0 %v128_v27 }
  0x39   :  { %273 = vmatprep.mubr.f32.mxu1 %v70_v32  ;;  %413 = vmatprep.mubr.f32.mxu0 %v86_v33 }
  0x3f   :  { %274 = vmatmul.mubr.f32.vlgmr.msra.gmra.mrb[0].mxu1 %v66_v36  ;;  %414 = vmatmul.mubr.f32.vlgmr.msra.gmra.mrb[0].mxu0 %v82_v37 }
  0xa9   :  { %v48_v38 = vpop.permute.xlu0 %47 }
  0xaa   :  { %v53_v39 = vrot.slane %v48_v38, %v52_v13 }
 0x112   :  { %v275_v40 = vpop.f32.mrb[0].mxu1  ;;  %v415_v41 = vpop.f32.mrb[0].mxu0 }
 0x113   :  { %v444_v42 = vadd.f32 %v275_v40, %v53_v39  ;;  %v277_v43 = vpop.f32.mrb[1].mxu1  ;;  %v417_v44 = vpop.f32.mrb[1].mxu0 }
 0x115   :  { %v445_v45 = vadd.f32 %v444_v42, %v415_v41 }
 0x117   :  { %v443_v46 = vmul.f32 -1.442695, %v445_v45 }
 0x119   :  { %458 = vpow2.f32 %v443_v46 }
 0x123   :  { %v459_v47 = vpop.eup %458 }
 0x124   :  { %v422_v48 = vadd.f32 1.0, %v459_v47 }
 0x126   :  { %460 = vrcp.f32 %v422_v48 }
 0x130   :  { %v461_v49 = vpop.eup %460 }
 0x131   :  { %426 = vst.msk [vmem:[#allocation8] sm:$0x1] %vm425_vm0, %v461_v49 }
 0x132   :  { %517 = shalt.err (!%p514_p6)
}
 0x133   :  { %s518_s14 = scalar_lea.hbm %s601_s3, 16 }
 0x134   :  { %p519_p7 = scmp.ne.s32.totalorder %s601_s3, %s518_s14  ;;  %p522_p8 = scmp.lt.u32.totalorder %s518_s14, %s601_s3 }
 0x136   :  { %p524_p9 = pnand %p522_p8, %p519_p7 }
 0x138   :  { %527 = shalt.err (!%p524_p9)
}
 0x139   :  { %436 = dma.vmem_to_hbm [thread:$0]  %s434_s9, 16, %s601_s3, [#allocation5]  }
 0x13a   :  { %532 = dma.done.wait [#allocation5], 16  }
 0x13b   :  { %533 = vsyncadd [#allocation5], 4294967280 }
 0x13c   :  { %440 = vsyncpa [#allocation4], 1 }
 0x13d   :  { %441 = vsyncpa [#allocation7], 1 }
 0x13e   :  { %442 = vsyncpa [#allocation5], 1 }

</bundles_post_ra>
